<compile_context>
chip_gen: v7x
topology: tpu7x:2x2x1
jax: 0.10.0
libtpu: 0.0.40
codegen_flags: <defaults>
</compile_context>

<pallas_src>
import jax
import jax.numpy as jnp
import numpy as np
from jax.experimental import pallas as pl
from jax.experimental.pallas import tpu as pltpu


_BP = 8  # padded batch rows (f32 sublane count)


def _round_up(n, m):
    return (n + m - 1) // m * m


def _param_rows(T, F, H):
    """Static row offsets of the packed parameter block (shared by prepare + kernel)."""
    r_wih = _BP * T                       # permutation block occupies rows [0, 8*T)
    r_whh = r_wih + _round_up(F, _BP)     # W_ih^T block (padded to 8-row boundary)
    r_vec = r_whh + _round_up(H, _BP)     # W_hh^T block
    n_rows = r_vec + _BP                  # bias / gate_mul / gate_add / fc_w / fc_b rows
    return r_wih, r_whh, r_vec, n_rows


def prepare_params(w_ih, w_hh, b_ih, b_hh, fc_w, fc_b, *, batch, seq_len):
    """One-time parameter packing/layout (at parameter-load time, not per forward call).

    Returns a single [n_rows, 4H] float32 block:
      rows [0, 8*T)           : batch-major -> time-major(+pad-to-8) permutation matrix
      rows [r_wih, r_wih+F)   : W_ih^T, i/f/o columns pre-scaled by 0.5
      rows [r_whh, r_whh+H)   : W_hh^T, i/f/o columns pre-scaled by 0.5
      row  r_vec + 0          : b_ih + b_hh, i/f/o lanes pre-scaled by 0.5
      row  r_vec + 1          : per-lane gate multiplier (0.5 for i/f/o, 1.0 for g)
      row  r_vec + 2          : per-lane gate offset     (0.5 for i/f/o, 0.0 for g)
      row  r_vec + 3          : fc weight (lanes [0, H))
      row  r_vec + 4, lane 0  : fc bias
    """
    w_ih = np.asarray(w_ih, np.float32)
    w_hh = np.asarray(w_hh, np.float32)
    b_ih = np.asarray(b_ih, np.float32)
    b_hh = np.asarray(b_hh, np.float32)
    fc_w = np.asarray(fc_w, np.float32)
    fc_b = np.asarray(fc_b, np.float32)

    H = w_hh.shape[1]
    F = w_ih.shape[1]
    H4 = 4 * H
    B, T = batch, seq_len
    assert B <= _BP, "batch is padded to 8 sublanes; batch must be <= 8"
    assert B * T <= H4, "permutation block must fit within the 4H lane width"

    r_wih, r_whh, r_vec, n_rows = _param_rows(T, F, H)

    # sigmoid(z) = 0.5 * tanh(z/2) + 0.5  ->  pre-scale i/f/o columns by 0.5 so the
    # kernel needs only ONE tanh pass over the full [*, 4H] gate slab per step.
    gate_mul = np.concatenate(
        [np.full(H, 0.5), np.full(H, 0.5), np.ones(H), np.full(H, 0.5)]).astype(np.float32)
    gate_add = np.concatenate(
        [np.full(H, 0.5), np.full(H, 0.5), np.zeros(H), np.full(H, 0.5)]).astype(np.float32)

    p = np.zeros((n_rows, H4), np.float32)
    # Permutation: dest row (t*8 + b)  <-  source row (b*T + t) of batch-major x.
    for t in range(T):
        for b in range(B):
            p[t * _BP + b, b * T + t] = 1.0
    p[r_wih:r_wih + F, :] = w_ih.T * gate_mul[None, :]
    p[r_whh:r_whh + H, :] = w_hh.T * gate_mul[None, :]
    p[r_vec + 0, :] = (b_ih + b_hh) * gate_mul
    p[r_vec + 1, :] = gate_mul
    p[r_vec + 2, :] = gate_add
    p[r_vec + 3, :H] = fc_w.reshape(H)
    p[r_vec + 4, 0] = fc_b.ravel()[0]
    return jnp.asarray(p)


def lstm_fc_kernel(x_ref, p_ref, out_ref):
    """x_ref: [B, T, F] float32 (batch_first), p_ref: packed [n_rows, 4H] float32,
    out_ref: [B, 1] float32."""
    B, T, F = x_ref.shape
    H4 = p_ref.shape[1]
    H = H4 // 4
    r_wih, r_whh, r_vec, _ = _param_rows(T, F, H)

    # ---- one-time parameter slices (static, 8-row-aligned) ----
    perm = p_ref[0:_BP * T, 0:B * T].astype(jnp.bfloat16)        # [8T, B*T] 0/1 matrix
    w_ih_t = p_ref[r_wih:r_wih + F, :].astype(jnp.bfloat16)      # [F, 4H]   (pre-scaled)
    w_hh_t = p_ref[r_whh:r_whh + H, :].astype(jnp.bfloat16)      # [H, 4H]   (pre-scaled)
    bias = p_ref[r_vec + 0:r_vec + 1, :]                         # [1, 4H]   (pre-scaled)
    gate_mul = p_ref[r_vec + 1:r_vec + 2, :]                     # [1, 4H]
    gate_add = p_ref[r_vec + 2:r_vec + 3, :]                     # [1, 4H]
    fc_w = p_ref[r_vec + 3:r_vec + 4, 0:H]                       # [1, H]
    fc_b = p_ref[r_vec + 4:r_vec + 5, 0:1]                       # [1, 1]

    # ---- fused batch_first -> time-major (+ pad batch to 8 sublanes) ----
    # One tiny MXU matmul against a constant permutation matrix instead of a host-side
    # transpose HLO or per-step sublane gathers: dest row (t*8 + b) <- x[b, t, :].
    x_bm = x_ref[...].reshape(B * T, F).astype(jnp.bfloat16)     # batch-major rows (free reshape)
    x_tm = jnp.dot(perm, x_bm,
                   preferred_element_type=jnp.float32).astype(jnp.bfloat16)  # [8T, F]

    # ---- hoisted input projection for ALL timesteps (+ folded, pre-scaled bias) ----
    gates_x = jnp.dot(x_tm, w_ih_t, preferred_element_type=jnp.float32) + bias   # [8T, 4H] f32

    h = jnp.zeros((_BP, H), jnp.float32)
    c = jnp.zeros((_BP, H), jnp.float32)

    # Static unroll over T (trace-time constant): the serial critical path per step is a
    # single bf16 MXU pass (h @ W_hh^T), one tanh over the full gate slab, one fma, and
    # the cell update + tanh(c).
    for t in range(T):
        pre = gates_x[t * _BP:(t + 1) * _BP, :] + jnp.dot(
            h.astype(jnp.bfloat16), w_hh_t, preferred_element_type=jnp.float32)   # [8, 4H]
        # Single EUP pass; sigmoid(i/f/o) lanes recovered via 0.5*tanh(z/2)+0.5 (the z/2
        # scale was folded into the packed weights/bias), tanh(g) lanes pass through.
        act = jnp.tanh(pre) * gate_mul + gate_add
        i_g = act[:, 0 * H:1 * H]
        f_g = act[:, 1 * H:2 * H]
        g_g = act[:, 2 * H:3 * H]
        o_g = act[:, 3 * H:4 * H]
        c = f_g * c + i_g * g_g
        h = o_g * jnp.tanh(c)

    # Dropout with p=0.0 (eval mode) is the identity.
    # TODO(synk): training-mode dropout (p > 0) would need pltpu.prng_* inside the kernel.

    # FC (H -> 1) on the VPU/XLU: broadcast-multiply + lane reduction (no MXU drain).
    pred = jnp.sum(h * fc_w, axis=-1, keepdims=True) + fc_b      # [8, 1]
    # Only the first B (valid) rows are written; padded rows carry don't-care state.
    out_ref[...] = jnp.maximum(pred[0:B, :], 0.0)


def lstm_model_forward(x_btf, packed_params):
    """x_btf: [B, T, F] float32 (batch_first, like the PyTorch module). Returns [B, 1]."""
    B = x_btf.shape[0]
    vmem = pl.BlockSpec(memory_space=pltpu.MemorySpace.VMEM)
    return pl.pallas_call(
        lstm_fc_kernel,
        out_shape=jax.ShapeDtypeStruct((B, 1), jnp.float32),
        in_specs=[vmem, vmem],
        out_specs=vmem,
    )(x_btf, packed_params)


def _reference_forward(x_btf, w_ih, w_hh, b_ih, b_hh, fc_w, fc_b, mxu_dtype=jnp.float32):
    """Pure-JAX reference of the PyTorch forward. mxu_dtype=bfloat16 models the bf16
    MXU-operand / f32-accumulation precision used by the kernel (state/gates stay f32)."""
    B, T, F = x_btf.shape
    H = w_hh.shape[1]
    w_ih_t = w_ih.T.astype(mxu_dtype)
    w_hh_t = w_hh.T.astype(mxu_dtype)
    h = jnp.zeros((B, H), jnp.float32)
    c = jnp.zeros((B, H), jnp.float32)
    for t in range(T):
        gates = (jnp.dot(x_btf[:, t, :].astype(mxu_dtype), w_ih_t,
                         preferred_element_type=jnp.float32)
                 + jnp.dot(h.astype(mxu_dtype), w_hh_t, preferred_element_type=jnp.float32)
                 + b_ih + b_hh)
        i_g = jax.nn.sigmoid(gates[:, 0 * H:1 * H])
        f_g = jax.nn.sigmoid(gates[:, 1 * H:2 * H])
        g_g = jnp.tanh(gates[:, 2 * H:3 * H])
        o_g = jax.nn.sigmoid(gates[:, 3 * H:4 * H])
        c = f_g * c + i_g * g_g
        h = o_g * jnp.tanh(c)
    pred = jnp.sum(h * fc_w.reshape(1, H), axis=-1, keepdims=True) + fc_b
    return jnp.maximum(pred, 0.0)


if __name__ == "__main__":
    # Shapes consistent with the module: batch=2, seq=8, features=2 (input_size), hidden=32.
    B, T, F, H = 2, 8, 2, 32

    key = jax.random.PRNGKey(0)
    k = jax.random.split(key, 7)
    bound = 1.0 / (H ** 0.5)   # PyTorch default LSTM/Linear init: U(-1/sqrt(H), 1/sqrt(H))

    x = jax.random.normal(k[0], (B, T, F), dtype=jnp.float32)
    w_ih = jax.random.uniform(k[1], (4 * H, F), minval=-bound, maxval=bound, dtype=jnp.float32)
    w_hh = jax.random.uniform(k[2], (4 * H, H), minval=-bound, maxval=bound, dtype=jnp.float32)
    b_ih = jax.random.uniform(k[3], (4 * H,), minval=-bound, maxval=bound, dtype=jnp.float32)
    b_hh = jax.random.uniform(k[4], (4 * H,), minval=-bound, maxval=bound, dtype=jnp.float32)
    fc_w = jax.random.uniform(k[5], (1, H), minval=-bound, maxval=bound, dtype=jnp.float32)
    fc_b = jax.random.uniform(k[6], (1,), minval=-bound, maxval=bound, dtype=jnp.float32)

    packed = prepare_params(w_ih, w_hh, b_ih, b_hh, fc_w, fc_b, batch=B, seq_len=T)
    packed = jax.block_until_ready(packed)        # one-time prep, not per-call

    fwd = jax.jit(lstm_model_forward)
    out = jax.block_until_ready(fwd(x, packed))

    # Structural check: identical math with bf16 MXU operands / f32 accumulation
    # (what the kernel computes); tight tolerance catches gate-order/layout bugs.
    ref_bf16 = _reference_forward(x, w_ih, w_hh, b_ih, b_hh, fc_w, fc_b,
                                  mxu_dtype=jnp.bfloat16)
    # Spec check: pure f32 math of the original PyTorch module; looser tolerance only
    # accounts for the intentional bf16 MXU-operand precision over the 8 recurrent steps.
    ref_f32 = _reference_forward(x, w_ih, w_hh, b_ih, b_hh, fc_w, fc_b,
                                 mxu_dtype=jnp.float32)

    assert out.shape == (B, 1), out.shape
    assert jnp.allclose(out, ref_bf16, atol=5e-3, rtol=5e-3), (out, ref_bf16)
    assert jnp.allclose(out, ref_f32, atol=3e-2, rtol=3e-2), (out, ref_f32)

    print("KERNEL_OK")
</pallas_src>

<mosaic_0001>
module attributes {stable_mosaic.version = 11 : i64} {
  func.func @lstm_fc_kernel(%arg0: memref<2x8x2xf32, #tpu.memory_space<vmem>>, %arg1: memref<112x128xf32, #tpu.memory_space<vmem>>, %arg2: memref<2x1xf32, #tpu.memory_space<vmem>>) attributes {dimension_semantics = [], scalar_prefetch = 0 : i64, scratch_operands = 0 : i64, tpu.core_type = #tpu.core_type<tc>} {
    %c0 = arith.constant 0 : index
    %c0_0 = arith.constant 0 : index
    %0 = vector.load %arg1[%c0, %c0_0] : memref<112x128xf32, #tpu.memory_space<vmem>>, vector<64x16xf32>
    %1 = arith.truncf %0 : vector<64x16xf32> to vector<64x16xbf16>
    %c64 = arith.constant 64 : index
    %c0_1 = arith.constant 0 : index
    %2 = vector.load %arg1[%c64, %c0_1] : memref<112x128xf32, #tpu.memory_space<vmem>>, vector<2x128xf32>
    %3 = arith.truncf %2 : vector<2x128xf32> to vector<2x128xbf16>
    %c72 = arith.constant 72 : index
    %c0_2 = arith.constant 0 : index
    %4 = vector.load %arg1[%c72, %c0_2] : memref<112x128xf32, #tpu.memory_space<vmem>>, vector<32x128xf32>
    %5 = arith.truncf %4 : vector<32x128xf32> to vector<32x128xbf16>
    %c104 = arith.constant 104 : index
    %c0_3 = arith.constant 0 : index
    %6 = vector.load %arg1[%c104, %c0_3] : memref<112x128xf32, #tpu.memory_space<vmem>>, vector<1x128xf32>
    %c105 = arith.constant 105 : index
    %c0_4 = arith.constant 0 : index
    %7 = vector.load %arg1[%c105, %c0_4] : memref<112x128xf32, #tpu.memory_space<vmem>>, vector<1x128xf32>
    %c106 = arith.constant 106 : index
    %c0_5 = arith.constant 0 : index
    %8 = vector.load %arg1[%c106, %c0_5] : memref<112x128xf32, #tpu.memory_space<vmem>>, vector<1x128xf32>
    %c107 = arith.constant 107 : index
    %c0_6 = arith.constant 0 : index
    %9 = vector.load %arg1[%c107, %c0_6] : memref<112x128xf32, #tpu.memory_space<vmem>>, vector<1x32xf32>
    %c108 = arith.constant 108 : index
    %c0_7 = arith.constant 0 : index
    %10 = vector.load %arg1[%c108, %c0_7] : memref<112x128xf32, #tpu.memory_space<vmem>>, vector<1x1xf32>
    %c0_8 = arith.constant 0 : index
    %c0_9 = arith.constant 0 : index
    %c0_10 = arith.constant 0 : index
    %11 = vector.load %arg0[%c0_8, %c0_9, %c0_10] : memref<2x8x2xf32, #tpu.memory_space<vmem>>, vector<2x8x2xf32>
    %12 = vector.shape_cast %11 : vector<2x8x2xf32> to vector<16x2xf32>
    %13 = arith.truncf %12 : vector<16x2xf32> to vector<16x2xbf16>
    %cst = arith.constant dense<0.000000e+00> : vector<64x2xf32>
    %14 = tpu.matmul %1, %13, %cst {dimension_numbers = #tpu.dot_dimension_numbers<[1], [0], [0], [1], [0, 0, 1, 1], [], []>} : vector<64x16xbf16>, vector<16x2xbf16>, vector<64x2xf32> -> vector<64x2xf32>
    %15 = arith.truncf %14 : vector<64x2xf32> to vector<64x2xbf16>
    %cst_11 = arith.constant dense<0.000000e+00> : vector<64x128xf32>
    %16 = tpu.matmul %15, %3, %cst_11 {dimension_numbers = #tpu.dot_dimension_numbers<[1], [0], [0], [1], [0, 0, 1, 1], [], []>} : vector<64x2xbf16>, vector<2x128xbf16>, vector<64x128xf32> -> vector<64x128xf32>
    %17 = vector.broadcast %6 : vector<1x128xf32> to vector<64x128xf32>
    %18 = arith.addf %16, %17 : vector<64x128xf32>
    %cst_12 = arith.constant 0.000000e+00 : f32
    %19 = vector.broadcast %cst_12 : f32 to vector<8x32xf32>
    %cst_13 = arith.constant 0.000000e+00 : f32
    %20 = vector.broadcast %cst_13 : f32 to vector<8x32xf32>
    %21 = vector.extract_strided_slice %18 {offsets = [0, 0], sizes = [8, 128], strides = [1, 1]} : vector<64x128xf32> to vector<8x128xf32>
    %22 = arith.truncf %19 : vector<8x32xf32> to vector<8x32xbf16>
    %cst_14 = arith.constant dense<0.000000e+00> : vector<8x128xf32>
    %23 = tpu.matmul %22, %5, %cst_14 {dimension_numbers = #tpu.dot_dimension_numbers<[1], [0], [0], [1], [0, 0, 1, 1], [], []>} : vector<8x32xbf16>, vector<32x128xbf16>, vector<8x128xf32> -> vector<8x128xf32>
    %24 = arith.addf %21, %23 : vector<8x128xf32>
    %25 = math.tanh %24 : vector<8x128xf32>
    %26 = vector.broadcast %7 : vector<1x128xf32> to vector<8x128xf32>
    %27 = arith.mulf %25, %26 : vector<8x128xf32>
    %28 = vector.broadcast %8 : vector<1x128xf32> to vector<8x128xf32>
    %29 = arith.addf %27, %28 : vector<8x128xf32>
    %30 = vector.extract_strided_slice %29 {offsets = [0, 0], sizes = [8, 32], strides = [1, 1]} : vector<8x128xf32> to vector<8x32xf32>
    %31 = vector.extract_strided_slice %29 {offsets = [0, 32], sizes = [8, 32], strides = [1, 1]} : vector<8x128xf32> to vector<8x32xf32>
    %32 = vector.extract_strided_slice %29 {offsets = [0, 64], sizes = [8, 32], strides = [1, 1]} : vector<8x128xf32> to vector<8x32xf32>
    %33 = vector.extract_strided_slice %29 {offsets = [0, 96], sizes = [8, 32], strides = [1, 1]} : vector<8x128xf32> to vector<8x32xf32>
    %34 = arith.mulf %31, %20 : vector<8x32xf32>
    %35 = arith.mulf %30, %32 : vector<8x32xf32>
    %36 = arith.addf %34, %35 : vector<8x32xf32>
    %37 = math.tanh %36 : vector<8x32xf32>
    %38 = arith.mulf %33, %37 : vector<8x32xf32>
    %39 = vector.extract_strided_slice %18 {offsets = [8, 0], sizes = [8, 128], strides = [1, 1]} : vector<64x128xf32> to vector<8x128xf32>
    %40 = arith.truncf %38 : vector<8x32xf32> to vector<8x32xbf16>
    %cst_15 = arith.constant dense<0.000000e+00> : vector<8x128xf32>
    %41 = tpu.matmul %40, %5, %cst_15 {dimension_numbers = #tpu.dot_dimension_numbers<[1], [0], [0], [1], [0, 0, 1, 1], [], []>} : vector<8x32xbf16>, vector<32x128xbf16>, vector<8x128xf32> -> vector<8x128xf32>
    %42 = arith.addf %39, %41 : vector<8x128xf32>
    %43 = math.tanh %42 : vector<8x128xf32>
    %44 = vector.broadcast %7 : vector<1x128xf32> to vector<8x128xf32>
    %45 = arith.mulf %43, %44 : vector<8x128xf32>
    %46 = vector.broadcast %8 : vector<1x128xf32> to vector<8x128xf32>
    %47 = arith.addf %45, %46 : vector<8x128xf32>
    %48 = vector.extract_strided_slice %47 {offsets = [0, 0], sizes = [8, 32], strides = [1, 1]} : vector<8x128xf32> to vector<8x32xf32>
    %49 = vector.extract_strided_slice %47 {offsets = [0, 32], sizes = [8, 32], strides = [1, 1]} : vector<8x128xf32> to vector<8x32xf32>
    %50 = vector.extract_strided_slice %47 {offsets = [0, 64], sizes = [8, 32], strides = [1, 1]} : vector<8x128xf32> to vector<8x32xf32>
    %51 = vector.extract_strided_slice %47 {offsets = [0, 96], sizes = [8, 32], strides = [1, 1]} : vector<8x128xf32> to vector<8x32xf32>
    %52 = arith.mulf %49, %36 : vector<8x32xf32>
    %53 = arith.mulf %48, %50 : vector<8x32xf32>
    %54 = arith.addf %52, %53 : vector<8x32xf32>
    %55 = math.tanh %54 : vector<8x32xf32>
    %56 = arith.mulf %51, %55 : vector<8x32xf32>
    %57 = vector.extract_strided_slice %18 {offsets = [16, 0], sizes = [8, 128], strides = [1, 1]} : vector<64x128xf32> to vector<8x128xf32>
    %58 = arith.truncf %56 : vector<8x32xf32> to vector<8x32xbf16>
    %cst_16 = arith.constant dense<0.000000e+00> : vector<8x128xf32>
    %59 = tpu.matmul %58, %5, %cst_16 {dimension_numbers = #tpu.dot_dimension_numbers<[1], [0], [0], [1], [0, 0, 1, 1], [], []>} : vector<8x32xbf16>, vector<32x128xbf16>, vector<8x128xf32> -> vector<8x128xf32>
    %60 = arith.addf %57, %59 : vector<8x128xf32>
    %61 = math.tanh %60 : vector<8x128xf32>
    %62 = vector.broadcast %7 : vector<1x128xf32> to vector<8x128xf32>
    %63 = arith.mulf %61, %62 : vector<8x128xf32>
    %64 = vector.broadcast %8 : vector<1x128xf32> to vector<8x128xf32>
    %65 = arith.addf %63, %64 : vector<8x128xf32>
    %66 = vector.extract_strided_slice %65 {offsets = [0, 0], sizes = [8, 32], strides = [1, 1]} : vector<8x128xf32> to vector<8x32xf32>
    %67 = vector.extract_strided_slice %65 {offsets = [0, 32], sizes = [8, 32], strides = [1, 1]} : vector<8x128xf32> to vector<8x32xf32>
    %68 = vector.extract_strided_slice %65 {offsets = [0, 64], sizes = [8, 32], strides = [1, 1]} : vector<8x128xf32> to vector<8x32xf32>
    %69 = vector.extract_strided_slice %65 {offsets = [0, 96], sizes = [8, 32], strides = [1, 1]} : vector<8x128xf32> to vector<8x32xf32>
    %70 = arith.mulf %67, %54 : vector<8x32xf32>
    %71 = arith.mulf %66, %68 : vector<8x32xf32>
    %72 = arith.addf %70, %71 : vector<8x32xf32>
    %73 = math.tanh %72 : vector<8x32xf32>
    %74 = arith.mulf %69, %73 : vector<8x32xf32>
    %75 = vector.extract_strided_slice %18 {offsets = [24, 0], sizes = [8, 128], strides = [1, 1]} : vector<64x128xf32> to vector<8x128xf32>
    %76 = arith.truncf %74 : vector<8x32xf32> to vector<8x32xbf16>
    %cst_17 = arith.constant dense<0.000000e+00> : vector<8x128xf32>
    %77 = tpu.matmul %76, %5, %cst_17 {dimension_numbers = #tpu.dot_dimension_numbers<[1], [0], [0], [1], [0, 0, 1, 1], [], []>} : vector<8x32xbf16>, vector<32x128xbf16>, vector<8x128xf32> -> vector<8x128xf32>
    %78 = arith.addf %75, %77 : vector<8x128xf32>
    %79 = math.tanh %78 : vector<8x128xf32>
    %80 = vector.broadcast %7 : vector<1x128xf32> to vector<8x128xf32>
    %81 = arith.mulf %79, %80 : vector<8x128xf32>
    %82 = vector.broadcast %8 : vector<1x128xf32> to vector<8x128xf32>
    %83 = arith.addf %81, %82 : vector<8x128xf32>
    %84 = vector.extract_strided_slice %83 {offsets = [0, 0], sizes = [8, 32], strides = [1, 1]} : vector<8x128xf32> to vector<8x32xf32>
    %85 = vector.extract_strided_slice %83 {offsets = [0, 32], sizes = [8, 32], strides = [1, 1]} : vector<8x128xf32> to vector<8x32xf32>
    %86 = vector.extract_strided_slice %83 {offsets = [0, 64], sizes = [8, 32], strides = [1, 1]} : vector<8x128xf32> to vector<8x32xf32>
    %87 = vector.extract_strided_slice %83 {offsets = [0, 96], sizes = [8, 32], strides = [1, 1]} : vector<8x128xf32> to vector<8x32xf32>
    %88 = arith.mulf %85, %72 : vector<8x32xf32>
    %89 = arith.mulf %84, %86 : vector<8x32xf32>
    %90 = arith.addf %88, %89 : vector<8x32xf32>
    %91 = math.tanh %90 : vector<8x32xf32>
    %92 = arith.mulf %87, %91 : vector<8x32xf32>
    %93 = vector.extract_strided_slice %18 {offsets = [32, 0], sizes = [8, 128], strides = [1, 1]} : vector<64x128xf32> to vector<8x128xf32>
    %94 = arith.truncf %92 : vector<8x32xf32> to vector<8x32xbf16>
    %cst_18 = arith.constant dense<0.000000e+00> : vector<8x128xf32>
    %95 = tpu.matmul %94, %5, %cst_18 {dimension_numbers = #tpu.dot_dimension_numbers<[1], [0], [0], [1], [0, 0, 1, 1], [], []>} : vector<8x32xbf16>, vector<32x128xbf16>, vector<8x128xf32> -> vector<8x128xf32>
    %96 = arith.addf %93, %95 : vector<8x128xf32>
    %97 = math.tanh %96 : vector<8x128xf32>
    %98 = vector.broadcast %7 : vector<1x128xf32> to vector<8x128xf32>
    %99 = arith.mulf %97, %98 : vector<8x128xf32>
    %100 = vector.broadcast %8 : vector<1x128xf32> to vector<8x128xf32>
    %101 = arith.addf %99, %100 : vector<8x128xf32>
    %102 = vector.extract_strided_slice %101 {offsets = [0, 0], sizes = [8, 32], strides = [1, 1]} : vector<8x128xf32> to vector<8x32xf32>
    %103 = vector.extract_strided_slice %101 {offsets = [0, 32], sizes = [8, 32], strides = [1, 1]} : vector<8x128xf32> to vector<8x32xf32>
    %104 = vector.extract_strided_slice %101 {offsets = [0, 64], sizes = [8, 32], strides = [1, 1]} : vector<8x128xf32> to vector<8x32xf32>
    %105 = vector.extract_strided_slice %101 {offsets = [0, 96], sizes = [8, 32], strides = [1, 1]} : vector<8x128xf32> to vector<8x32xf32>
    %106 = arith.mulf %103, %90 : vector<8x32xf32>
    %107 = arith.mulf %102, %104 : vector<8x32xf32>
    %108 = arith.addf %106, %107 : vector<8x32xf32>
    %109 = math.tanh %108 : vector<8x32xf32>
    %110 = arith.mulf %105, %109 : vector<8x32xf32>
    %111 = vector.extract_strided_slice %18 {offsets = [40, 0], sizes = [8, 128], strides = [1, 1]} : vector<64x128xf32> to vector<8x128xf32>
    %112 = arith.truncf %110 : vector<8x32xf32> to vector<8x32xbf16>
    %cst_19 = arith.constant dense<0.000000e+00> : vector<8x128xf32>
    %113 = tpu.matmul %112, %5, %cst_19 {dimension_numbers = #tpu.dot_dimension_numbers<[1], [0], [0], [1], [0, 0, 1, 1], [], []>} : vector<8x32xbf16>, vector<32x128xbf16>, vector<8x128xf32> -> vector<8x128xf32>
    %114 = arith.addf %111, %113 : vector<8x128xf32>
    %115 = math.tanh %114 : vector<8x128xf32>
    %116 = vector.broadcast %7 : vector<1x128xf32> to vector<8x128xf32>
    %117 = arith.mulf %115, %116 : vector<8x128xf32>
    %118 = vector.broadcast %8 : vector<1x128xf32> to vector<8x128xf32>
    %119 = arith.addf %117, %118 : vector<8x128xf32>
    %120 = vector.extract_strided_slice %119 {offsets = [0, 0], sizes = [8, 32], strides = [1, 1]} : vector<8x128xf32> to vector<8x32xf32>
    %121 = vector.extract_strided_slice %119 {offsets = [0, 32], sizes = [8, 32], strides = [1, 1]} : vector<8x128xf32> to vector<8x32xf32>
    %122 = vector.extract_strided_slice %119 {offsets = [0, 64], sizes = [8, 32], strides = [1, 1]} : vector<8x128xf32> to vector<8x32xf32>
    %123 = vector.extract_strided_slice %119 {offsets = [0, 96], sizes = [8, 32], strides = [1, 1]} : vector<8x128xf32> to vector<8x32xf32>
    %124 = arith.mulf %121, %108 : vector<8x32xf32>
    %125 = arith.mulf %120, %122 : vector<8x32xf32>
    %126 = arith.addf %124, %125 : vector<8x32xf32>
    %127 = math.tanh %126 : vector<8x32xf32>
    %128 = arith.mulf %123, %127 : vector<8x32xf32>
    %129 = vector.extract_strided_slice %18 {offsets = [48, 0], sizes = [8, 128], strides = [1, 1]} : vector<64x128xf32> to vector<8x128xf32>
    %130 = arith.truncf %128 : vector<8x32xf32> to vector<8x32xbf16>
    %cst_20 = arith.constant dense<0.000000e+00> : vector<8x128xf32>
    %131 = tpu.matmul %130, %5, %cst_20 {dimension_numbers = #tpu.dot_dimension_numbers<[1], [0], [0], [1], [0, 0, 1, 1], [], []>} : vector<8x32xbf16>, vector<32x128xbf16>, vector<8x128xf32> -> vector<8x128xf32>
    %132 = arith.addf %129, %131 : vector<8x128xf32>
    %133 = math.tanh %132 : vector<8x128xf32>
    %134 = vector.broadcast %7 : vector<1x128xf32> to vector<8x128xf32>
    %135 = arith.mulf %133, %134 : vector<8x128xf32>
    %136 = vector.broadcast %8 : vector<1x128xf32> to vector<8x128xf32>
    %137 = arith.addf %135, %136 : vector<8x128xf32>
    %138 = vector.extract_strided_slice %137 {offsets = [0, 0], sizes = [8, 32], strides = [1, 1]} : vector<8x128xf32> to vector<8x32xf32>
    %139 = vector.extract_strided_slice %137 {offsets = [0, 32], sizes = [8, 32], strides = [1, 1]} : vector<8x128xf32> to vector<8x32xf32>
    %140 = vector.extract_strided_slice %137 {offsets = [0, 64], sizes = [8, 32], strides = [1, 1]} : vector<8x128xf32> to vector<8x32xf32>
    %141 = vector.extract_strided_slice %137 {offsets = [0, 96], sizes = [8, 32], strides = [1, 1]} : vector<8x128xf32> to vector<8x32xf32>
    %142 = arith.mulf %139, %126 : vector<8x32xf32>
    %143 = arith.mulf %138, %140 : vector<8x32xf32>
    %144 = arith.addf %142, %143 : vector<8x32xf32>
    %145 = math.tanh %144 : vector<8x32xf32>
    %146 = arith.mulf %141, %145 : vector<8x32xf32>
    %147 = vector.extract_strided_slice %18 {offsets = [56, 0], sizes = [8, 128], strides = [1, 1]} : vector<64x128xf32> to vector<8x128xf32>
    %148 = arith.truncf %146 : vector<8x32xf32> to vector<8x32xbf16>
    %cst_21 = arith.constant dense<0.000000e+00> : vector<8x128xf32>
    %149 = tpu.matmul %148, %5, %cst_21 {dimension_numbers = #tpu.dot_dimension_numbers<[1], [0], [0], [1], [0, 0, 1, 1], [], []>} : vector<8x32xbf16>, vector<32x128xbf16>, vector<8x128xf32> -> vector<8x128xf32>
    %150 = arith.addf %147, %149 : vector<8x128xf32>
    %151 = math.tanh %150 : vector<8x128xf32>
    %152 = vector.broadcast %7 : vector<1x128xf32> to vector<8x128xf32>
    %153 = arith.mulf %151, %152 : vector<8x128xf32>
    %154 = vector.broadcast %8 : vector<1x128xf32> to vector<8x128xf32>
    %155 = arith.addf %153, %154 : vector<8x128xf32>
    %156 = vector.extract_strided_slice %155 {offsets = [0, 0], sizes = [8, 32], strides = [1, 1]} : vector<8x128xf32> to vector<8x32xf32>
    %157 = vector.extract_strided_slice %155 {offsets = [0, 32], sizes = [8, 32], strides = [1, 1]} : vector<8x128xf32> to vector<8x32xf32>
    %158 = vector.extract_strided_slice %155 {offsets = [0, 64], sizes = [8, 32], strides = [1, 1]} : vector<8x128xf32> to vector<8x32xf32>
    %159 = vector.extract_strided_slice %155 {offsets = [0, 96], sizes = [8, 32], strides = [1, 1]} : vector<8x128xf32> to vector<8x32xf32>
    %160 = arith.mulf %157, %144 : vector<8x32xf32>
    %161 = arith.mulf %156, %158 : vector<8x32xf32>
    %162 = arith.addf %160, %161 : vector<8x32xf32>
    %163 = math.tanh %162 : vector<8x32xf32>
    %164 = arith.mulf %159, %163 : vector<8x32xf32>
    %165 = vector.broadcast %9 : vector<1x32xf32> to vector<8x32xf32>
    %166 = arith.mulf %164, %165 : vector<8x32xf32>
    %cst_22 = arith.constant dense<0.000000e+00> : vector<8xf32>
    %167 = vector.multi_reduction <add>, %166, %cst_22 [1] : vector<8x32xf32> to vector<8xf32>
    %168 = vector.shape_cast %167 : vector<8xf32> to vector<8x1xf32>
    %169 = vector.broadcast %10 : vector<1x1xf32> to vector<8x1xf32>
    %170 = arith.addf %168, %169 : vector<8x1xf32>
    %171 = vector.extract_strided_slice %170 {offsets = [0, 0], sizes = [2, 1], strides = [1, 1]} : vector<8x1xf32> to vector<2x1xf32>
    %cst_23 = arith.constant 0.000000e+00 : f32
    %172 = vector.broadcast %cst_23 : f32 to vector<2x1xf32>
    %173 = arith.maximumf %171, %172 : vector<2x1xf32>
    %c0_24 = arith.constant 0 : index
    %c0_25 = arith.constant 0 : index
    %174 = vector.load %arg2[%c0_24, %c0_25] : memref<2x1xf32, #tpu.memory_space<vmem>>, vector<2x1xf32>
    tpu.vector_store %arg2[%c0_24, %c0_25], %173 {strides = array<i32>} : memref<2x1xf32, #tpu.memory_space<vmem>>, vector<2x1xf32>,
    return
  }
}

</mosaic_0001>

<bundles_post_ra>
// kernel: lstm_model_forward.1
= control target key start
LH: loop header
LB: loop body
LE: loop exit
PB: predicated region body
PF: predicated region fallthrough
CT: control target
= control target key end

     0   :  { %7 = vsyncpa [#allocation3], 0  ;;  %s1004_s9 = smov [#allocation2]   ;;  %s1183_s0 = inlined_call_operand.vmem [shape: f32[2,8,2], index: 0, kind: input, shape index: {}]   ;;  %s1184_s1 = inlined_call_operand.hbm [shape: f32[112,128], index: 1, kind: input, shape index: {}]   ;;  %s1185_s2 = inlined_call_operand.vmem [shape: f32[2,1], index: 2, kind: output, shape index: {}]  }
   0x1   :  { %s15_s10 = sshll.u32 %s1004_s9, 4  ;;  %s980_s13 = scalar_lea.hbm %s1184_s1, 1792  ;;  %s16_s10 = int_to_ptr.vmem [resolvable:$true] %s15_s10 }
   0x2   :  { %p981_p0 = scmp.ne.s32.totalorder %s1184_s1, %s980_s13  ;;  %p984_p1 = scmp.lt.u32.totalorder %s980_s13, %s1184_s1 }
   0x4   :  { %p986_p2 = pnand %p984_p1, %p981_p0 }
   0x6   :  { %989 = shalt.err (!%p986_p2)
}
   0x7   :  { %s990_s18 = scalar_lea.vmem %s16_s10, 1792  ;;  %p995_p4 = scmp.lt.s32.totalorder %s16_s10, %s16_s10 }
   0x8   :  { %p991_p3 = scmp.ne.s32.totalorder %s16_s10, %s990_s18  ;;  %p996_p5 = scmp.lt.s32.totalorder %s990_s18, %s990_s18 }
   0xa   :  { %p997_p6 = por %p996_p5, %p995_p4 }
   0xc   :  { %p998_p7 = pnand %p997_p6, %p991_p3 }
   0xe   :  { %1001 = shalt.err (!%p998_p7)
}
   0xf   :  { %s1005_s19 = smov 128   ;;  %s1006_s20 = smov 8  }
  0x10   :  { %21 = dma.hbm_to_vmem [thread:$0]  %s1184_s1, 1792, %s16_s10, [#allocation3], %s1005_s19, %s1005_s19, %s1006_s20  }
  0x11   :  { %1002 = dma.done.wait [#allocation3], 1792  }
  0x12   :  { %1003 = vsyncadd [#allocation3], 4294965504  ;;  %v51_v0 = vld [vmem:[%s1183_s0] sm:$0xff]  ;;  %v52_v1 = vld [vmem:[%s1183_s0 + $0x8] sm:$0xff]  ;;  %vm54_vm0 = vcmask 130048   ;;  %v1007_v15 = vmov 0.0  }
  0x13   :  { %v26_v2 = vld [vmem:[#allocation2] sm:$0xff]  ;;  %v53_v3 = vpack.c.bf16 %v52_v1, %v51_v0  ;;  %v27_v4 = vld [vmem:[#allocation2 + $0x8] sm:$0xff]  ;;  %v28_v5 = vld [vmem:[#allocation2 + $0x10] sm:$0xff]  ;;  %vm153_vm1 = vcmask 1040384   ;;  %vm1008_vm2 = vmmov 0   ;;  %v1009_v25 = vmov 0  }
  0x14   :  { %v29_v6 = vld [vmem:[#allocation2 + $0x18] sm:$0xff]  ;;  %v34_v7 = vpack.c.bf16 %v27_v4, %v26_v2  ;;  %v30_v8 = vld [vmem:[#allocation2 + $0x20] sm:$0xff]  ;;  %v31_v9 = vld [vmem:[#allocation2 + $0x28] sm:$0xff]  ;;  %vm140_vm3 = vcmask 15360   ;;  %s1010_s0 = smov 64   ;;  %s1011_s1 = smov 32  }
  0x15   :  { %v40_v10 = vld [vmem:[#allocation2 + $0x48] sm:$0xff]  ;;  %854 = vmatprep.subr.bf16.mxu0 %v53_v3  ;;  %v35_v11 = vpack.c.bf16 %v29_v6, %v28_v5  ;;  %v41_v12 = vld [vmem:[#allocation2 + $0x50] sm:$0xff]  ;;  %v36_v13 = vpack.c.bf16 %v31_v9, %v30_v8  ;;  %v33_v17 = vld [vmem:[#allocation2 + $0x38] sm:$0xff]  ;;  %vm222_vm4 = vcmask 261120   ;;  %s1012_s27 = smov 96   ;;  %vm793_vm5 = vcmask 1024  }
  0x16   :  { %855 = vmatpush3.bf16.msra.mxu0 %v53_v3  ;;  %856 = vmatprep.mubr.msk.bf16.mxu0 %vm54_vm0, %v34_v7  ;;  %v1047_v14 = vpack.c.bf16 %v41_v12, %v40_v10  ;;  %v32_v16 = vld [vmem:[#allocation2 + $0x30] sm:$0xff]  ;;  %v38_v19 = vld [vmem:[#allocation2 + $0x40] sm:$0x3]  ;;  %v42_v20 = vld [vmem:[#allocation2 + $0x58] sm:$0xff] }
  0x17   :  { %874 = vmatprep.subr.bf16.mxu0 %v1007_v15  ;;  %v37_v18 = vpack.c.bf16 %v33_v17, %v32_v16  ;;  %v43_v21 = vld [vmem:[#allocation2 + $0x60] sm:$0xff]  ;;  %v39_v22 = vpack.c.bf16 %v38_v19, %v38_v19  ;;  %v804_v42 = vld [vmem:[#allocation2 + $0x68] ss:$0 sm:$0xff]  ;;  %v1084_v59 = vld [vmem:[#allocation2 + $0x69] ss:$0 sm:$0xff] }
  0x18   :  { %v1055_v23 = vpack.c.bf16 %v43_v21, %v42_v20  ;;  %v1088_v62 = vld [vmem:[#allocation2 + $0x6a] ss:$0 sm:$0xff] }
  0x19   :  { %857 = vmatmul.mubr.msk.bf16.vlgmr.msra.gmra.mrb[0].mxu0 %vm54_vm0, %v35_v11  ;;  %938 = vmatprep.subr.msk.bf16.mxu1 %vm153_vm1, %v39_v22  ;;  %v155_v24 = vsel %vm153_vm1, %v39_v22, 0 }
  0x1a   :  { %860 = vmatprep.mubr.msk.bf16.mxu0 %vm54_vm0, %v36_v13  ;;  %875 = vmatpush3.bf16.msra.mxu0 %v1047_v14 }
  0x1b   :  { %876 = vmatprep.subr.bf16.mxu0 %v1007_v15  ;;  %865 = vmatpush3.bf16.msra.mxu1 %v155_v24 }
  0x1c   :  { %882 = vmatprep.subr.bf16.mxu1 %v1007_v15 }
  0x1e   :  { %877 = vmatpush3.bf16.msra.mxu0 %v1055_v23 }
  0x1f   :  { %890 = vmatprep.subr.bf16.mxu0 %v1007_v15 }
  0x21   :  { %861 = vmatmul.mubr.msk.bf16.gmra.mrb[4].mxu0 %vm54_vm0, %v37_v18 }
  0x22   :  { %878 = vmatprep.mubr.msk.bf16.mxu0 %vm1008_vm2, %v1007_v15 }
  0x29   :  { %879 = vmatmul.mubr.bf16.vlgmr.msra.gmra.mrb[8].mxu0 %v1009_v25 }
  0x2a   :  { %891 = vmatpush3.bf16.msra.mxu0 %v1047_v14  ;;  %894 = vmatprep.mubr.msk.bf16.mxu0 %vm1008_vm2, %v1007_v15 }
  0x2b   :  { %892 = vmatprep.subr.bf16.mxu0 %v1007_v15 }
  0x2e   :  { %893 = vmatpush3.bf16.msra.mxu0 %v1055_v23 }
  0x2f   :  { %906 = vmatprep.subr.bf16.mxu0 %v1007_v15 }
  0xec   :  { %v858_v26 = vpop.f32.mrb[0].mxu0 }
  0xed   :  { %v101_v27 = vpop.f32.mrb[1].mxu0 }
  0xee   :  { %v859_v28 = vpop.f32.mrb[2].mxu0 }
  0xef   :  { %v133_v29 = vpack.c.bf16 %v859_v28, %v858_v26  ;;  %v104_v30 = vpop.f32.mrb[3].mxu0 }
  0xf0   :  { %v132_v31 = vpack.c.bf16 %v104_v30, %v101_v27 }
  0xf2   :  { %866 = vmatprep.mubr.msk.bf16.mxu1 %vm140_vm3, %v132_v31 }
  0xf3   :  { %867 = vmatmul.mubr.msk.bf16.vlgmr.msra.gmra.mrb[0].mxu1 %vm140_vm3, %v133_v29 }
  0xf4   :  { %v862_v32 = vpop.f32.mrb[4].mxu0  ;;  %883 = vmatpush3.bf16.msra.mxu1 %v1047_v14 }
  0xf5   :  { %v117_v33 = vpop.f32.mrb[5].mxu0  ;;  %884 = vmatprep.subr.bf16.mxu1 %v1007_v15 }
  0xf6   :  { %v863_v34 = vpop.f32.mrb[6].mxu0 }
  0xf7   :  { %v135_v35 = vpack.c.bf16 %v863_v34, %v862_v32  ;;  %v120_v36 = vpop.f32.mrb[7].mxu0 }
  0xf8   :  { %v134_v37 = vpack.c.bf16 %v120_v36, %v117_v33  ;;  %885 = vmatpush3.bf16.msra.mxu1 %v1055_v23 }
  0xf9   :  { %898 = vmatprep.subr.bf16.mxu1 %v1007_v15 }
  0xfa   :  { %870 = vmatprep.mubr.msk.bf16.mxu1 %vm140_vm3, %v134_v37 }
  0xfb   :  { %871 = vmatmul.mubr.msk.bf16.gmra.mrb[4].mxu1 %vm140_vm3, %v135_v35 }
  0xfc   :  { %886 = vmatprep.mubr.msk.bf16.mxu1 %vm1008_vm2, %v1007_v15  ;;  %v260_v38 = vpop.f32.mrb[8].mxu0 }
  0xfd   :  { %v880_v39 = vpop.f32.mrb[9].mxu0 }
  0xfe   :  { %v263_v40 = vpop.f32.mrb[10].mxu0 }
  0xff   :  { %v881_v41 = vpop.f32.mrb[11].mxu0 }
 0x1c6   :  { %v868_v43 = vpop.f32.mrb[0].mxu1 }
 0x1c7   :  { %v1074_v44 = vadd.f32 %v868_v43, %v804_v42  ;;  %v191_v45 = vpop.f32.mrb[1].mxu1 }
 0x1c8   :  { %v192_v46 = vadd.f32 %v804_v42, %v191_v45  ;;  %v869_v47 = vpop.f32.mrb[2].mxu1 }
 0x1c9   :  { %v1076_v48 = vadd.f32 %v869_v47, %v804_v42  ;;  %v194_v49 = vpop.f32.mrb[3].mxu1 }
 0x1ca   :  { %v266_v50 = vadd.f32 %v260_v38, %v192_v46  ;;  %v195_v51 = vadd.f32 %v804_v42, %v194_v49 }
 0x1cc   :  { %948 = vtanh.f32 %v266_v50 }
 0x1ce   :  { %v872_v52 = vpop.f32.mrb[4].mxu1 }
 0x1cf   :  { %v1078_v53 = vadd.f32 %v872_v52, %v804_v42  ;;  %v207_v54 = vpop.f32.mrb[5].mxu1 }
 0x1d0   :  { %v1080_v55 = vadd.f32 %v804_v42, %v207_v54  ;;  %v873_v56 = vpop.f32.mrb[6].mxu1 }
 0x1d1   :  { %v1082_v57 = vadd.f32 %v873_v56, %v804_v42  ;;  %v210_v58 = vpop.f32.mrb[7].mxu1 }
 0x1d2   :  { %v1086_v60 = vadd.f32 %v804_v42, %v210_v58 }
 0x1d6   :  { %v949_v61 = vpop.eup %948 }
 0x1d7   :  { %v272_v63 = vmul.f32 %v949_v61, %v1084_v59 }
 0x1d9   :  { %v277_v0 = vadd.f32 %v1088_v62, %v272_v63 }
 0x1db   :  { %280 = vrot.lane.b32.xlu0 %v277_v0, %s1010_s0  ;;  %v278_v3 = vmul.f32 0.0, %v277_v0 }
 0x24d   :  { %v281_v1 = vpop.permute.xlu0 %280 }
 0x24e   :  { %v283_v2 = vmul.f32 %v281_v1, %v277_v0 }
 0x250   :  { %285 = vrot.lane.b32.xlu0 %v283_v2, %s1011_s1 }
 0x2c2   :  { %v286_v4 = vpop.permute.xlu0 %285 }
 0x2c3   :  { %v288_v5 = vadd.f32 %v286_v4, %v278_v3 }
 0x2c5   :  { %950 = vtanh.f32 %v288_v5 }
 0x2cf   :  { %v951_v6 = vpop.eup %950 }
 0x2d0   :  { %291 = vrot.lane.b32.xlu1 %v951_v6, %s1010_s0 }
 0x342   :  { %v292_v7 = vpop.permute.xlu1 %291 }
 0x343   :  { %v294_v8 = vmul.f32 %v292_v7, %v277_v0 }
 0x345   :  { %v295_v9 = vpack.c.bf16 %v294_v8, %v294_v8 }
 0x347   :  { %297 = vrot.lane.b32.xlu1 %v295_v9, %s1011_s1 }
 0x3b9   :  { %v298_v10 = vpop.permute.xlu1 %297 }
 0x3ba   :  { %887 = vmatmul.mubr.msk.bf16.vlgmr.msra.gmra.mrb[8].mxu1 %vm222_vm4, %v298_v10 }
 0x3bb   :  { %899 = vmatpush3.bf16.msra.mxu1 %v1047_v14  ;;  %902 = vmatprep.mubr.msk.bf16.mxu1 %vm1008_vm2, %v1007_v15 }
 0x3bc   :  { %900 = vmatprep.subr.bf16.mxu1 %v1007_v15 }
 0x3bf   :  { %901 = vmatpush3.bf16.msra.mxu1 %v1055_v23 }
 0x3c0   :  { %914 = vmatprep.subr.bf16.mxu1 %v1007_v15 }
 0x48d   :  { %v336_v11 = vpop.f32.mrb[8].mxu1 }
 0x48e   :  { %v342_v12 = vadd.f32 %v336_v11, %v195_v51  ;;  %v888_v13 = vpop.f32.mrb[9].mxu1 }
 0x48f   :  { %v339_v16 = vpop.f32.mrb[10].mxu1 }
 0x490   :  { %952 = vtanh.f32 %v342_v12  ;;  %v889_v17 = vpop.f32.mrb[11].mxu1 }
 0x49a   :  { %v953_v18 = vpop.eup %952 }
 0x49b   :  { %v344_v19 = vmul.f32 %v953_v18, %v1084_v59 }
 0x49d   :  { %v345_v20 = vadd.f32 %v1088_v62, %v344_v19 }
 0x49f   :  { %348 = vrot.lane.b32.xlu0 %v345_v20, %s1010_s0  ;;  %v346_v24 = vmul.f32 %v345_v20, %v288_v5 }
 0x511   :  { %v349_v21 = vpop.permute.xlu0 %348 }
 0x512   :  { %v351_v22 = vmul.f32 %v349_v21, %v345_v20 }
 0x514   :  { %353 = vrot.lane.b32.xlu1 %v351_v22, %s1011_s1 }
 0x586   :  { %v354_v25 = vpop.permute.xlu1 %353 }
 0x587   :  { %v356_v26 = vadd.f32 %v354_v25, %v346_v24 }
 0x589   :  { %954 = vtanh.f32 %v356_v26 }
 0x593   :  { %v955_v27 = vpop.eup %954 }
 0x594   :  { %359 = vrot.lane.b32.xlu0 %v955_v27, %s1010_s0 }
 0x606   :  { %v360_v28 = vpop.permute.xlu0 %359 }
 0x607   :  { %v362_v29 = vmul.f32 %v360_v28, %v345_v20 }
 0x609   :  { %v363_v30 = vpack.c.bf16 %v362_v29, %v362_v29 }
 0x60b   :  { %365 = vrot.lane.b32.xlu1 %v363_v30, %s1011_s1 }
 0x67d   :  { %v366_v31 = vpop.permute.xlu1 %365 }
 0x67e   :  { %895 = vmatmul.mubr.msk.bf16.vlgmr.msra.gmra.mrb[12].mxu0 %vm222_vm4, %v366_v31 }
 0x67f   :  { %907 = vmatpush3.bf16.msra.mxu0 %v1047_v14  ;;  %910 = vmatprep.mubr.msk.bf16.mxu0 %vm1008_vm2, %v1007_v15 }
 0x680   :  { %908 = vmatprep.subr.bf16.mxu0 %v1007_v15 }
 0x683   :  { %909 = vmatpush3.bf16.msra.mxu0 %v1055_v23 }
 0x684   :  { %922 = vmatprep.subr.bf16.mxu0 %v1007_v15 }
 0x751   :  { %v404_v32 = vpop.f32.mrb[12].mxu0 }
 0x752   :  { %v410_v33 = vadd.f32 %v404_v32, %v1074_v44  ;;  %v896_v34 = vpop.f32.mrb[13].mxu0 }
 0x753   :  { %v407_v35 = vpop.f32.mrb[14].mxu0 }
 0x754   :  { %956 = vtanh.f32 %v410_v33  ;;  %v897_v36 = vpop.f32.mrb[15].mxu0 }
 0x75e   :  { %v957_v37 = vpop.eup %956 }
 0x75f   :  { %v412_v38 = vmul.f32 %v957_v37, %v1084_v59 }
 0x761   :  { %v413_v39 = vadd.f32 %v1088_v62, %v412_v38 }
 0x763   :  { %416 = vrot.lane.b32.xlu0 %v413_v39, %s1010_s0  ;;  %v414_v42 = vmul.f32 %v413_v39, %v356_v26 }
 0x7d5   :  { %v417_v40 = vpop.permute.xlu0 %416 }
 0x7d6   :  { %v419_v41 = vmul.f32 %v417_v40, %v413_v39 }
 0x7d8   :  { %421 = vrot.lane.b32.xlu1 %v419_v41, %s1011_s1 }
 0x84a   :  { %v422_v43 = vpop.permute.xlu1 %421 }
 0x84b   :  { %v424_v45 = vadd.f32 %v422_v43, %v414_v42 }
 0x84d   :  { %958 = vtanh.f32 %v424_v45 }
 0x857   :  { %v959_v44 = vpop.eup %958 }
 0x858   :  { %427 = vrot.lane.b32.xlu0 %v959_v44, %s1010_s0 }
 0x8ca   :  { %v428_v46 = vpop.permute.xlu0 %427 }
 0x8cb   :  { %v430_v47 = vmul.f32 %v428_v46, %v413_v39 }
 0x8cd   :  { %v431_v49 = vpack.c.bf16 %v430_v47, %v430_v47 }
 0x8cf   :  { %433 = vrot.lane.b32.xlu1 %v431_v49, %s1011_s1 }
 0x941   :  { %v434_v50 = vpop.permute.xlu1 %433 }
 0x942   :  { %903 = vmatmul.mubr.msk.bf16.vlgmr.msra.gmra.mrb[12].mxu1 %vm222_vm4, %v434_v50 }
 0x943   :  { %915 = vmatpush3.bf16.msra.mxu1 %v1047_v14  ;;  %918 = vmatprep.mubr.msk.bf16.mxu1 %vm1008_vm2, %v1007_v15 }
 0x944   :  { %916 = vmatprep.subr.bf16.mxu1 %v1007_v15 }
 0x947   :  { %917 = vmatpush3.bf16.msra.mxu1 %v1055_v23 }
 0x948   :  { %930 = vmatprep.subr.bf16.mxu1 %v1007_v15 }
 0xa15   :  { %v472_v51 = vpop.f32.mrb[12].mxu1 }
 0xa16   :  { %v478_v52 = vadd.f32 %v472_v51, %v1076_v48  ;;  %v904_v54 = vpop.f32.mrb[13].mxu1 }
 0xa17   :  { %v475_v56 = vpop.f32.mrb[14].mxu1 }
 0xa18   :  { %960 = vtanh.f32 %v478_v52  ;;  %v905_v58 = vpop.f32.mrb[15].mxu1 }
 0xa22   :  { %v961_v61 = vpop.eup %960 }
 0xa23   :  { %v480_v63 = vmul.f32 %v961_v61, %v1084_v59 }
 0xa25   :  { %v481_v0 = vadd.f32 %v1088_v62, %v480_v63 }
 0xa27   :  { %484 = vrot.lane.b32.xlu0 %v481_v0, %s1010_s0  ;;  %v482_v3 = vmul.f32 %v481_v0, %v424_v45 }
 0xa99   :  { %v485_v1 = vpop.permute.xlu0 %484 }
 0xa9a   :  { %v487_v2 = vmul.f32 %v485_v1, %v481_v0 }
 0xa9c   :  { %489 = vrot.lane.b32.xlu1 %v487_v2, %s1011_s1 }
 0xb0e   :  { %v490_v4 = vpop.permute.xlu1 %489 }
 0xb0f   :  { %v492_v5 = vadd.f32 %v490_v4, %v482_v3 }
 0xb11   :  { %962 = vtanh.f32 %v492_v5 }
 0xb1b   :  { %v963_v48 = vpop.eup %962 }
 0xb1c   :  { %495 = vrot.lane.b32.xlu0 %v963_v48, %s1010_s0 }
 0xb8e   :  { %v496_v6 = vpop.permute.xlu0 %495 }
 0xb8f   :  { %v498_v7 = vmul.f32 %v496_v6, %v481_v0 }
 0xb91   :  { %v499_v8 = vpack.c.bf16 %v498_v7, %v498_v7 }
 0xb93   :  { %501 = vrot.lane.b32.xlu1 %v499_v8, %s1011_s1 }
 0xc05   :  { %v502_v9 = vpop.permute.xlu1 %501 }
 0xc06   :  { %911 = vmatmul.mubr.msk.bf16.vlgmr.msra.gmra.mrb[16].mxu0 %vm222_vm4, %v502_v9 }
 0xc07   :  { %923 = vmatpush3.bf16.msra.mxu0 %v1047_v14  ;;  %926 = vmatprep.mubr.msk.bf16.mxu0 %vm1008_vm2, %v1007_v15 }
 0xc08   :  { %924 = vmatprep.subr.bf16.mxu0 %v1007_v15 }
 0xc0b   :  { %925 = vmatpush3.bf16.msra.mxu0 %v1055_v23 }
 0xcd9   :  { %v540_v10 = vpop.f32.mrb[16].mxu0 }
 0xcda   :  { %v546_v11 = vadd.f32 %v540_v10, %v1080_v55  ;;  %v912_v12 = vpop.f32.mrb[17].mxu0 }
 0xcdb   :  { %v543_v13 = vpop.f32.mrb[18].mxu0 }
 0xcdc   :  { %964 = vtanh.f32 %v546_v11  ;;  %v913_v16 = vpop.f32.mrb[19].mxu0  ;;  %v818_v13 = vld [vmem:[#allocation2 + $0x6b] ss:$0 sm:$0xff] }
 0xce6   :  { %v965_v17 = vpop.eup %964 }
 0xce7   :  { %v548_v18 = vmul.f32 %v965_v17, %v1084_v59 }
 0xce9   :  { %v549_v19 = vadd.f32 %v1088_v62, %v548_v18 }
 0xceb   :  { %552 = vrot.lane.b32.xlu0 %v549_v19, %s1010_s0  ;;  %v550_v22 = vmul.f32 %v549_v19, %v492_v5 }
 0xd5d   :  { %v553_v20 = vpop.permute.xlu0 %552 }
 0xd5e   :  { %v555_v21 = vmul.f32 %v553_v20, %v549_v19 }
 0xd60   :  { %557 = vrot.lane.b32.xlu1 %v555_v21, %s1011_s1 }
 0xdd2   :  { %v558_v24 = vpop.permute.xlu1 %557 }
 0xdd3   :  { %v560_v25 = vadd.f32 %v558_v24, %v550_v22  ;;  %v819_v24 = vld [vmem:[#allocation2 + $0x6c] ss:$0 sm:$0xff] }
 0xdd5   :  { %966 = vtanh.f32 %v560_v25 }
 0xddf   :  { %v967_v55 = vpop.eup %966 }
 0xde0   :  { %563 = vrot.lane.b32.xlu0 %v967_v55, %s1010_s0 }
 0xe52   :  { %v564_v26 = vpop.permute.xlu0 %563 }
 0xe53   :  { %v566_v27 = vmul.f32 %v564_v26, %v549_v19 }
 0xe55   :  { %v567_v28 = vpack.c.bf16 %v566_v27, %v566_v27 }
 0xe57   :  { %569 = vrot.lane.b32.xlu1 %v567_v28, %s1011_s1 }
 0xec9   :  { %v570_v29 = vpop.permute.xlu1 %569 }
 0xeca   :  { %919 = vmatmul.mubr.msk.bf16.vlgmr.msra.gmra.mrb[16].mxu1 %vm222_vm4, %v570_v29 }
 0xecb   :  { %931 = vmatpush3.bf16.msra.mxu1 %v1047_v14  ;;  %934 = vmatprep.mubr.msk.bf16.mxu1 %vm1008_vm2, %v1007_v15 }
 0xecc   :  { %932 = vmatprep.subr.bf16.mxu1 %v1007_v15 }
 0xecf   :  { %933 = vmatpush3.bf16.msra.mxu1 %v1055_v23 }
 0xf9d   :  { %v608_v30 = vpop.f32.mrb[16].mxu1 }
 0xf9e   :  { %v614_v31 = vadd.f32 %v608_v30, %v1086_v60  ;;  %v920_v32 = vpop.f32.mrb[17].mxu1 }
 0xf9f   :  { %v611_v33 = vpop.f32.mrb[18].mxu1 }
 0xfa0   :  { %968 = vtanh.f32 %v614_v31  ;;  %v921_v34 = vpop.f32.mrb[19].mxu1 }
 0xfaa   :  { %v969_v35 = vpop.eup %968 }
 0xfab   :  { %v616_v36 = vmul.f32 %v969_v35, %v1084_v59 }
 0xfad   :  { %v617_v37 = vadd.f32 %v1088_v62, %v616_v36 }
 0xfaf   :  { %620 = vrot.lane.b32.xlu0 %v617_v37, %s1010_s0  ;;  %v618_v15 = vmul.f32 %v617_v37, %v560_v25 }
0x1021   :  { %v621_v14 = vpop.permute.xlu0 %620 }
0x1022   :  { %v623_v38 = vmul.f32 %v621_v14, %v617_v37 }
0x1024   :  { %625 = vrot.lane.b32.xlu1 %v623_v38, %s1011_s1 }
0x1096   :  { %v626_v23 = vpop.permute.xlu1 %625 }
0x1097   :  { %v628_v39 = vadd.f32 %v626_v23, %v618_v15 }
0x1099   :  { %970 = vtanh.f32 %v628_v39 }
0x10a3   :  { %v971_v60 = vpop.eup %970 }
0x10a4   :  { %631 = vrot.lane.b32.xlu0 %v971_v60, %s1010_s0 }
0x1116   :  { %v632_v40 = vpop.permute.xlu0 %631 }
0x1117   :  { %v634_v41 = vmul.f32 %v632_v40, %v617_v37 }
0x1119   :  { %v635_v42 = vpack.c.bf16 %v634_v41, %v634_v41 }
0x111b   :  { %637 = vrot.lane.b32.xlu1 %v635_v42, %s1011_s1 }
0x118d   :  { %v638_v43 = vpop.permute.xlu1 %637 }
0x118e   :  { %927 = vmatmul.mubr.msk.bf16.vlgmr.msra.gmra.mrb[20].mxu0 %vm222_vm4, %v638_v43 }
0x1261   :  { %v676_v45 = vpop.f32.mrb[20].mxu0 }
0x1262   :  { %v682_v44 = vadd.f32 %v676_v45, %v1078_v53  ;;  %v928_v46 = vpop.f32.mrb[21].mxu0 }
0x1263   :  { %v679_v47 = vpop.f32.mrb[22].mxu0 }
0x1264   :  { %972 = vtanh.f32 %v682_v44  ;;  %v929_v49 = vpop.f32.mrb[23].mxu0 }
0x126e   :  { %v973_v50 = vpop.eup %972 }
0x126f   :  { %v684_v51 = vmul.f32 %v973_v50, %v1084_v59 }
0x1271   :  { %v685_v52 = vadd.f32 %v1088_v62, %v684_v51 }
0x1273   :  { %688 = vrot.lane.b32.xlu0 %v685_v52, %s1010_s0  ;;  %v686_v58 = vmul.f32 %v685_v52, %v628_v39 }
0x12e5   :  { %v689_v54 = vpop.permute.xlu0 %688 }
0x12e6   :  { %v691_v56 = vmul.f32 %v689_v54, %v685_v52 }
0x12e8   :  { %693 = vrot.lane.b32.xlu1 %v691_v56, %s1011_s1 }
0x135a   :  { %v694_v61 = vpop.permute.xlu1 %693 }
0x135b   :  { %v696_v63 = vadd.f32 %v694_v61, %v686_v58 }
0x135d   :  { %974 = vtanh.f32 %v696_v63 }
0x1367   :  { %v975_v53 = vpop.eup %974 }
0x1368   :  { %699 = vrot.lane.b32.xlu0 %v975_v53, %s1010_s0 }
0x13da   :  { %v700_v0 = vpop.permute.xlu0 %699 }
0x13db   :  { %v702_v1 = vmul.f32 %v700_v0, %v685_v52 }
0x13dd   :  { %v703_v2 = vpack.c.bf16 %v702_v1, %v702_v1 }
0x13df   :  { %705 = vrot.lane.b32.xlu1 %v703_v2, %s1011_s1 }
0x1451   :  { %v706_v3 = vpop.permute.xlu1 %705 }
0x1452   :  { %935 = vmatmul.mubr.msk.bf16.vlgmr.msra.gmra.mrb[20].mxu1 %vm222_vm4, %v706_v3 }
0x1525   :  { %v744_v4 = vpop.f32.mrb[20].mxu1 }
0x1526   :  { %v750_v5 = vadd.f32 %v744_v4, %v1082_v57  ;;  %v936_v48 = vpop.f32.mrb[21].mxu1 }
0x1527   :  { %v747_v6 = vpop.f32.mrb[22].mxu1 }
0x1528   :  { %976 = vtanh.f32 %v750_v5  ;;  %v937_v7 = vpop.f32.mrb[23].mxu1 }
0x1532   :  { %v977_v8 = vpop.eup %976 }
0x1533   :  { %v752_v9 = vmul.f32 %v977_v8, %v1084_v59 }
0x1535   :  { %v753_v10 = vadd.f32 %v1088_v62, %v752_v9 }
0x1537   :  { %756 = vrot.lane.b32.xlu0 %v753_v10, %s1010_s0  ;;  %v754_v16 = vmul.f32 %v753_v10, %v696_v63 }
0x15a9   :  { %v757_v11 = vpop.permute.xlu0 %756 }
0x15aa   :  { %v759_v12 = vmul.f32 %v757_v11, %v753_v10 }
0x15ac   :  { %761 = vrot.lane.b32.xlu1 %v759_v12, %s1011_s1 }
0x15b0   :  { %776 = vrot.lane.b32.xlu1 %v818_v13, %s1012_s27 }
0x161e   :  { %v762_v57 = vpop.permute.xlu1 %761 }
0x161f   :  { %v764_v17 = vadd.f32 %v762_v57, %v754_v16 }
0x1621   :  { %978 = vtanh.f32 %v764_v17 }
0x1622   :  { %v777_v59 = vpop.permute.xlu1 %776 }
0x162b   :  { %v979_v18 = vpop.eup %978 }
0x162c   :  { %767 = vrot.lane.b32.xlu0 %v979_v18, %s1010_s0 }
0x169e   :  { %v768_v19 = vpop.permute.xlu0 %767 }
0x169f   :  { %v770_v20 = vmul.f32 %v768_v19, %v753_v10 }
0x16a1   :  { %v779_v62 = vmul.f32 %v777_v59, %v770_v20 }
0x16a3   :  { %781 = vrot.lane.b32.xlu0 %v779_v62, %s1011_s1 }
0x1715   :  { %v782_v21 = vpop.permute.xlu0 %781 }
0x1716   :  { %v784_v22 = vsel %vm222_vm4, %v782_v21, 0.0 }
0x1717   :  { %785 = vadd.xlane.f32.xlu1 %v784_v22 }
0x17a4   :  { %v786_v25 = vpop.xlane.xlu1 %785 }
0x17a5   :  { %v791_v55 = vadd.f32 %v819_v24, %v786_v25 }
0x17a7   :  { %v792_v26 = vmax.f32 %v791_v55, 0.0 }
0x17a9   :  { %794 = vst.msk [vmem:[%s1185_s2] sm:$0x3] %vm793_vm5, %v792_v26 }
0x17aa   :  { %799 = vsyncpa [#allocation3], 1 }

</bundles_post_ra>
